<compile_context>
chip_gen: v5e
topology: v5e:2x2
jax: 0.10.0
libtpu: 0.0.40
codegen_flags: <defaults>
</compile_context>

<pallas_src>
import functools

import jax
import jax.numpy as jnp
from jax import lax
from jax.experimental import pallas as pl
from jax.experimental.pallas import tpu as pltpu


def _dense_tk_kernel(w_ref, b_ref, x_ref, o_ref, *, wp):
    # w_ref : (9, Cout, Cin_pad)  fused per-tap weights, tap t = dh*3 + dw
    # b_ref : (Cout, 1)           fused bias
    # x_ref : (Cin_pad, TM)       zero-padded pixels, lane-dense; row-major over
    #                             (hp, wp) per sample, sample stride divides TM
    # o_ref : (Cout, TM)          same lane layout as the input
    cin, tm = x_ref.shape
    x = x_ref[...]
    # Aligned zero-extension (all pieces are 128-lane multiples) so each tap
    # view below is a plain static lane slice: no wrap-around, no unaligned
    # concatenation.  Out-of-sample reads only ever feed discarded output lanes.
    zpad = jnp.zeros((cin, 128), x.dtype)
    xx = jnp.concatenate([zpad, x, zpad], axis=1)            # (Cin_pad, TM+256)

    acc = jnp.zeros(o_ref.shape, jnp.float32)
    for t in range(9):
        dh, dw = divmod(t, 3)
        off = (dh - 1) * wp + (dw - 1)                       # static lane offset
        xt = xx[:, 128 + off:128 + off + tm]                 # (Cin_pad, TM)
        acc = acc + jnp.dot(w_ref[t], xt, preferred_element_type=jnp.float32)
    # TODO(synk): for large TM the shifted views could use pltpu.roll (XLU slot)
    # instead of slices of the zero-extended copy.
    o_ref[...] = (acc + b_ref[...]).astype(o_ref.dtype)


def _num_tensorcores():
    """Best-effort TensorCore count per chip (perf-only; never affects results)."""
    try:
        kind = jax.devices()[0].device_kind.lower()
    except Exception:
        return 1
    # v7x has 2 TensorCores per chip; v4/v5p expose a 2-core megacore.
    if "v7" in kind or "v4" in kind or "v5p" in kind:
        return 2
    return 1


@jax.jit
def dense_tk_forward(x_nchw, wconv_hwio, bconv, wfc, bfc):
    """Fused dense_tk forward.  x_nchw: (N, Cin, H, W) f32 -> (N, Cout, H, W)."""
    N, Cin, H, W = x_nchw.shape
    kh, kw, wc_in, Clat = wconv_hwio.shape
    Cout = wfc.shape[1]
    # The algebraic conv+fc fusion is only valid for the module DEFAULTS
    # activation=Identity and groups=1 (anything else needs the unfused
    # two-matmul path).
    assert (kh, kw) == (3, 3) and wc_in == Cin and wfc.shape[0] == Cin + Clat

    Hp, Wp = H + 2, W + 2
    S = Hp * Wp                                       # padded pixels per sample
    S_pad = ((S + 127) // 128) * 128                  # lane-aligned sample stride
    Cin_pad = ((Cin + 7) // 8) * 8                    # sublane-aligned channels

    # ---- algebraic fusion of conv3x3 (Cin->Clat) and 1x1 fc (Cin+Clat->Cout) ---
    wx = wfc[:Cin, :]                                 # multiplies the x branch of cat
    wz = wfc[Cin:, :]                                 # multiplies the conv branch
    w_eff = jnp.einsum("hwil,lo->hwio", wconv_hwio, wz)       # (3, 3, Cin, Cout)
    w_eff = w_eff.at[1, 1].add(wx)                    # x == centre tap of the window
    b_eff = (bfc + bconv @ wz).reshape(Cout, 1)       # (Cout, 1)
    w_taps = jnp.transpose(w_eff.reshape(9, Cin, Cout), (0, 2, 1))   # (9, Cout, Cin)
    w_taps = jnp.pad(w_taps, ((0, 0), (0, 0), (0, Cin_pad - Cin)))   # (9, Cout, Cin_pad)

    # ---- lane-dense padded layout (no im2col materialisation, ~1.3x of raw x) ---
    x_cn = jnp.transpose(x_nchw, (1, 0, 2, 3))                        # (Cin, N, H, W)
    x_p = jnp.pad(x_cn, ((0, 0), (0, 0), (1, 1), (1, 1)))             # (Cin, N, Hp, Wp)
    x_flat = jnp.pad(x_p.reshape(Cin, N, S), ((0, 0), (0, 0), (0, S_pad - S)))
    x_flat = x_flat.reshape(Cin, N * S_pad)
    x_flat = jnp.pad(x_flat, ((0, Cin_pad - Cin), (0, 0)))            # (Cin_pad, N*S_pad)

    # ---- grid: split the pixel axis across samples only on multi-TC chips ------
    grid_m = 2 if (_num_tensorcores() >= 2 and N % 2 == 0) else 1
    tm = (N // grid_m) * S_pad                        # tiles stay sample-aligned
    # TODO(synk): for much larger N*H*W, tile tm further and set vmem_limit_bytes
    # against the chip's VMEM (v7x has half the VMEM of v5e/v6e).

    kernel = functools.partial(_dense_tk_kernel, wp=Wp)
    flops = 2 * Cout * 9 * Cin_pad * N * S_pad
    bytes_accessed = 4 * (x_flat.size + w_taps.size + b_eff.size + Cout * N * S_pad)

    out_flat = pl.pallas_call(
        kernel,
        out_shape=jax.ShapeDtypeStruct((Cout, N * S_pad), x_nchw.dtype),
        grid_spec=pltpu.PrefetchScalarGridSpec(
            num_scalar_prefetch=0,
            grid=(grid_m,),
            in_specs=[
                pl.BlockSpec((9, Cout, Cin_pad), lambda i: (0, 0, 0)),  # resident weights
                pl.BlockSpec((Cout, 1), lambda i: (0, 0)),              # resident bias
                pl.BlockSpec((Cin_pad, tm), lambda i: (0, i)),          # padded pixels
            ],
            out_specs=pl.BlockSpec((Cout, tm), lambda i: (0, i)),       # lane-dense out
        ),
        compiler_params=pltpu.CompilerParams(
            dimension_semantics=("parallel",),
        ),
        cost_estimate=pl.CostEstimate(
            flops=flops, transcendentals=0, bytes_accessed=bytes_accessed),
    )(w_taps, b_eff, x_flat)

    # (Cout, N*S_pad) -> (N, Cout, H, W): drop the lane tail pad and the halo ring.
    out = out_flat.reshape(Cout, N, S_pad)[:, :, :S].reshape(Cout, N, Hp, Wp)
    out = out[:, :, 1:1 + H, 1:1 + W]
    return jnp.transpose(out, (1, 0, 2, 3))


def dense_tk_reference(x_nchw, wconv_hwio, bconv, wfc, bfc):
    """Pure-JAX reference matching the PyTorch forward (for verification)."""
    Clat = wconv_hwio.shape[3]
    Cout = wfc.shape[1]
    wconv_oihw = jnp.transpose(wconv_hwio, (3, 2, 0, 1))            # (Clat, Cin, 3, 3)
    z = lax.conv_general_dilated(
        x_nchw, wconv_oihw, window_strides=(1, 1), padding="SAME",
        dimension_numbers=("NCHW", "OIHW", "NCHW"),
    ) + bconv.reshape(1, Clat, 1, 1)
    cat = jnp.concatenate([x_nchw, z], axis=1)
    wfc_oihw = jnp.transpose(wfc, (1, 0)).reshape(Cout, wfc.shape[0], 1, 1)
    out = lax.conv_general_dilated(
        cat, wfc_oihw, window_strides=(1, 1), padding="SAME",
        dimension_numbers=("NCHW", "OIHW", "NCHW"),
    ) + bfc.reshape(1, Cout, 1, 1)
    return out


if __name__ == "__main__":
    # Small shapes consistent with the module: in_channels=4, lat_channels=4
    # (default lat = in), out_channels=8, batch=2, spatial=16.
    N, Cin, H, W = 2, 4, 16, 16
    Clat, Cout = Cin, 8

    key = jax.random.PRNGKey(0)
    kx, kw1, kb1, kw2, kb2 = jax.random.split(key, 5)
    x = jax.random.normal(kx, (N, Cin, H, W), dtype=jnp.float32)
    # Deterministic synthetic parameters (HWIO conv weights; dense 1x1 weights).
    wconv = jax.random.normal(kw1, (3, 3, Cin, Clat), dtype=jnp.float32) * 0.1
    bconv = jax.random.normal(kb1, (Clat,), dtype=jnp.float32) * 0.1
    wfc = jax.random.normal(kw2, (Cin + Clat, Cout), dtype=jnp.float32) * 0.1
    bfc = jax.random.normal(kb2, (Cout,), dtype=jnp.float32) * 0.1

    out = jax.block_until_ready(dense_tk_forward(x, wconv, bconv, wfc, bfc))
    ref = jax.block_until_ready(dense_tk_reference(x, wconv, bconv, wfc, bfc))

    assert out.shape == (N, Cout, H, W), out.shape
    assert jnp.allclose(out, ref, atol=1e-4, rtol=1e-4), float(jnp.max(jnp.abs(out - ref)))
    print("KERNEL_OK")
</pallas_src>

<mosaic_0001>
module attributes {stable_mosaic.version = 11 : i64} {
  func.func @_dense_tk_kernel(%arg0: i32, %arg1: memref<9x8x8xf32, #tpu.memory_space<vmem>>, %arg2: memref<8x1xf32, #tpu.memory_space<vmem>>, %arg3: memref<8x768xf32, #tpu.memory_space<vmem>>, %arg4: memref<8x768xf32, #tpu.memory_space<vmem>>) attributes {dimension_semantics = [#tpu.dimension_semantics<parallel>], iteration_bounds = array<i64: 1>, scalar_prefetch = 0 : i64, scratch_operands = 0 : i64, tpu.core_type = #tpu.core_type<tc>, window_params = [{pipeline_mode = #tpu.pipeline_mode<synchronous>, transform_indices = @transform_0, window_bounds = array<i64: 9, 8, 8>}, {pipeline_mode = #tpu.pipeline_mode<synchronous>, transform_indices = @transform_1, window_bounds = array<i64: 8, 1>}, {transform_indices = @transform_2, window_bounds = array<i64: 8, 768>}, {transform_indices = @transform_3, window_bounds = array<i64: 8, 768>}]} {
    %c0 = arith.constant 0 : index
    %c0_0 = arith.constant 0 : index
    %0 = vector.load %arg3[%c0, %c0_0] : memref<8x768xf32, #tpu.memory_space<vmem>>, vector<8x768xf32>
    %cst = arith.constant 0.000000e+00 : f32
    %1 = vector.broadcast %cst : f32 to vector<8x128xf32>
    %2 = tpu.concatenate %1, %0, %1 in 1 : vector<8x128xf32>, vector<8x768xf32>, vector<8x128xf32> -> vector<8x1024xf32>
    %cst_1 = arith.constant 0.000000e+00 : f32
    %3 = vector.broadcast %cst_1 : f32 to vector<8x768xf32>
    %4 = vector.extract_strided_slice %2 {offsets = [0, 109], sizes = [8, 768], strides = [1, 1]} : vector<8x1024xf32> to vector<8x768xf32>
    %c0_2 = arith.constant 0 : index
    %c0_3 = arith.constant 0 : index
    %c0_4 = arith.constant 0 : index
    %5 = vector.load %arg1[%c0_2, %c0_3, %c0_4] : memref<9x8x8xf32, #tpu.memory_space<vmem>>, vector<1x8x8xf32>
    %6 = vector.shape_cast %5 : vector<1x8x8xf32> to vector<8x8xf32>
    %cst_5 = arith.constant dense<0.000000e+00> : vector<8x768xf32>
    %7 = tpu.matmul %6, %4, %cst_5 {dimension_numbers = #tpu.dot_dimension_numbers<[1], [0], [0], [1], [0, 0, 1, 1], [], []>} : vector<8x8xf32>, vector<8x768xf32>, vector<8x768xf32> -> vector<8x768xf32>
    %8 = arith.addf %3, %7 : vector<8x768xf32>
    %9 = vector.extract_strided_slice %2 {offsets = [0, 110], sizes = [8, 768], strides = [1, 1]} : vector<8x1024xf32> to vector<8x768xf32>
    %c1 = arith.constant 1 : index
    %c0_6 = arith.constant 0 : index
    %c0_7 = arith.constant 0 : index
    %10 = vector.load %arg1[%c1, %c0_6, %c0_7] : memref<9x8x8xf32, #tpu.memory_space<vmem>>, vector<1x8x8xf32>
    %11 = vector.shape_cast %10 : vector<1x8x8xf32> to vector<8x8xf32>
    %cst_8 = arith.constant dense<0.000000e+00> : vector<8x768xf32>
    %12 = tpu.matmul %11, %9, %cst_8 {dimension_numbers = #tpu.dot_dimension_numbers<[1], [0], [0], [1], [0, 0, 1, 1], [], []>} : vector<8x8xf32>, vector<8x768xf32>, vector<8x768xf32> -> vector<8x768xf32>
    %13 = arith.addf %8, %12 : vector<8x768xf32>
    %14 = vector.extract_strided_slice %2 {offsets = [0, 111], sizes = [8, 768], strides = [1, 1]} : vector<8x1024xf32> to vector<8x768xf32>
    %c2 = arith.constant 2 : index
    %c0_9 = arith.constant 0 : index
    %c0_10 = arith.constant 0 : index
    %15 = vector.load %arg1[%c2, %c0_9, %c0_10] : memref<9x8x8xf32, #tpu.memory_space<vmem>>, vector<1x8x8xf32>
    %16 = vector.shape_cast %15 : vector<1x8x8xf32> to vector<8x8xf32>
    %cst_11 = arith.constant dense<0.000000e+00> : vector<8x768xf32>
    %17 = tpu.matmul %16, %14, %cst_11 {dimension_numbers = #tpu.dot_dimension_numbers<[1], [0], [0], [1], [0, 0, 1, 1], [], []>} : vector<8x8xf32>, vector<8x768xf32>, vector<8x768xf32> -> vector<8x768xf32>
    %18 = arith.addf %13, %17 : vector<8x768xf32>
    %19 = vector.extract_strided_slice %2 {offsets = [0, 127], sizes = [8, 768], strides = [1, 1]} : vector<8x1024xf32> to vector<8x768xf32>
    %c3 = arith.constant 3 : index
    %c0_12 = arith.constant 0 : index
    %c0_13 = arith.constant 0 : index
    %20 = vector.load %arg1[%c3, %c0_12, %c0_13] : memref<9x8x8xf32, #tpu.memory_space<vmem>>, vector<1x8x8xf32>
    %21 = vector.shape_cast %20 : vector<1x8x8xf32> to vector<8x8xf32>
    %cst_14 = arith.constant dense<0.000000e+00> : vector<8x768xf32>
    %22 = tpu.matmul %21, %19, %cst_14 {dimension_numbers = #tpu.dot_dimension_numbers<[1], [0], [0], [1], [0, 0, 1, 1], [], []>} : vector<8x8xf32>, vector<8x768xf32>, vector<8x768xf32> -> vector<8x768xf32>
    %23 = arith.addf %18, %22 : vector<8x768xf32>
    %24 = vector.extract_strided_slice %2 {offsets = [0, 128], sizes = [8, 768], strides = [1, 1]} : vector<8x1024xf32> to vector<8x768xf32>
    %c4 = arith.constant 4 : index
    %c0_15 = arith.constant 0 : index
    %c0_16 = arith.constant 0 : index
    %25 = vector.load %arg1[%c4, %c0_15, %c0_16] : memref<9x8x8xf32, #tpu.memory_space<vmem>>, vector<1x8x8xf32>
    %26 = vector.shape_cast %25 : vector<1x8x8xf32> to vector<8x8xf32>
    %cst_17 = arith.constant dense<0.000000e+00> : vector<8x768xf32>
    %27 = tpu.matmul %26, %24, %cst_17 {dimension_numbers = #tpu.dot_dimension_numbers<[1], [0], [0], [1], [0, 0, 1, 1], [], []>} : vector<8x8xf32>, vector<8x768xf32>, vector<8x768xf32> -> vector<8x768xf32>
    %28 = arith.addf %23, %27 : vector<8x768xf32>
    %29 = vector.extract_strided_slice %2 {offsets = [0, 129], sizes = [8, 768], strides = [1, 1]} : vector<8x1024xf32> to vector<8x768xf32>
    %c5 = arith.constant 5 : index
    %c0_18 = arith.constant 0 : index
    %c0_19 = arith.constant 0 : index
    %30 = vector.load %arg1[%c5, %c0_18, %c0_19] : memref<9x8x8xf32, #tpu.memory_space<vmem>>, vector<1x8x8xf32>
    %31 = vector.shape_cast %30 : vector<1x8x8xf32> to vector<8x8xf32>
    %cst_20 = arith.constant dense<0.000000e+00> : vector<8x768xf32>
    %32 = tpu.matmul %31, %29, %cst_20 {dimension_numbers = #tpu.dot_dimension_numbers<[1], [0], [0], [1], [0, 0, 1, 1], [], []>} : vector<8x8xf32>, vector<8x768xf32>, vector<8x768xf32> -> vector<8x768xf32>
    %33 = arith.addf %28, %32 : vector<8x768xf32>
    %34 = vector.extract_strided_slice %2 {offsets = [0, 145], sizes = [8, 768], strides = [1, 1]} : vector<8x1024xf32> to vector<8x768xf32>
    %c6 = arith.constant 6 : index
    %c0_21 = arith.constant 0 : index
    %c0_22 = arith.constant 0 : index
    %35 = vector.load %arg1[%c6, %c0_21, %c0_22] : memref<9x8x8xf32, #tpu.memory_space<vmem>>, vector<1x8x8xf32>
    %36 = vector.shape_cast %35 : vector<1x8x8xf32> to vector<8x8xf32>
    %cst_23 = arith.constant dense<0.000000e+00> : vector<8x768xf32>
    %37 = tpu.matmul %36, %34, %cst_23 {dimension_numbers = #tpu.dot_dimension_numbers<[1], [0], [0], [1], [0, 0, 1, 1], [], []>} : vector<8x8xf32>, vector<8x768xf32>, vector<8x768xf32> -> vector<8x768xf32>
    %38 = arith.addf %33, %37 : vector<8x768xf32>
    %39 = vector.extract_strided_slice %2 {offsets = [0, 146], sizes = [8, 768], strides = [1, 1]} : vector<8x1024xf32> to vector<8x768xf32>
    %c7 = arith.constant 7 : index
    %c0_24 = arith.constant 0 : index
    %c0_25 = arith.constant 0 : index
    %40 = vector.load %arg1[%c7, %c0_24, %c0_25] : memref<9x8x8xf32, #tpu.memory_space<vmem>>, vector<1x8x8xf32>
    %41 = vector.shape_cast %40 : vector<1x8x8xf32> to vector<8x8xf32>
    %cst_26 = arith.constant dense<0.000000e+00> : vector<8x768xf32>
    %42 = tpu.matmul %41, %39, %cst_26 {dimension_numbers = #tpu.dot_dimension_numbers<[1], [0], [0], [1], [0, 0, 1, 1], [], []>} : vector<8x8xf32>, vector<8x768xf32>, vector<8x768xf32> -> vector<8x768xf32>
    %43 = arith.addf %38, %42 : vector<8x768xf32>
    %44 = vector.extract_strided_slice %2 {offsets = [0, 147], sizes = [8, 768], strides = [1, 1]} : vector<8x1024xf32> to vector<8x768xf32>
    %c8 = arith.constant 8 : index
    %c0_27 = arith.constant 0 : index
    %c0_28 = arith.constant 0 : index
    %45 = vector.load %arg1[%c8, %c0_27, %c0_28] : memref<9x8x8xf32, #tpu.memory_space<vmem>>, vector<1x8x8xf32>
    %46 = vector.shape_cast %45 : vector<1x8x8xf32> to vector<8x8xf32>
    %cst_29 = arith.constant dense<0.000000e+00> : vector<8x768xf32>
    %47 = tpu.matmul %46, %44, %cst_29 {dimension_numbers = #tpu.dot_dimension_numbers<[1], [0], [0], [1], [0, 0, 1, 1], [], []>} : vector<8x8xf32>, vector<8x768xf32>, vector<8x768xf32> -> vector<8x768xf32>
    %48 = arith.addf %43, %47 : vector<8x768xf32>
    %c0_30 = arith.constant 0 : index
    %c0_31 = arith.constant 0 : index
    %49 = vector.load %arg2[%c0_30, %c0_31] : memref<8x1xf32, #tpu.memory_space<vmem>>, vector<8x1xf32>
    %50 = vector.broadcast %49 : vector<8x1xf32> to vector<8x768xf32>
    %51 = arith.addf %48, %50 : vector<8x768xf32>
    %c0_32 = arith.constant 0 : index
    %c0_33 = arith.constant 0 : index
    %52 = vector.load %arg4[%c0_32, %c0_33] : memref<8x768xf32, #tpu.memory_space<vmem>>, vector<8x768xf32>
    tpu.vector_store %arg4[%c0_32, %c0_33], %51 {strides = array<i32>} : memref<8x768xf32, #tpu.memory_space<vmem>>, vector<8x768xf32>,
    return
  }
  func.func @transform_0(%arg0: i32) -> (i32, i32, i32) {
    %c0_i32 = arith.constant 0 : i32
    %c0_i32_0 = arith.constant 0 : i32
    %c0_i32_1 = arith.constant 0 : i32
    %c0_i32_2 = arith.constant 0 : i32
    return %c0_i32, %c0_i32_0, %c0_i32_1 : i32, i32, i32
  }
  func.func @transform_1(%arg0: i32) -> (i32, i32) {
    %c0_i32 = arith.constant 0 : i32
    %c0_i32_0 = arith.constant 0 : i32
    %c0_i32_1 = arith.constant 0 : i32
    return %c0_i32, %c0_i32_0 : i32, i32
  }
  func.func @transform_2(%arg0: i32) -> (i32, i32) {
    %c0_i32 = arith.constant 0 : i32
    %c0_i32_0 = arith.constant 0 : i32
    return %c0_i32, %arg0 : i32, i32
  }
  func.func @transform_3(%arg0: i32) -> (i32, i32) {
    %c0_i32 = arith.constant 0 : i32
    %c0_i32_0 = arith.constant 0 : i32
    return %c0_i32, %arg0 : i32, i32
  }
}

</mosaic_0001>

<bundles_post_ra>
// kernel: dense_tk_forward.1
= control target key start
LH: loop header
LB: loop body
LE: loop exit
PB: predicated region body
PF: predicated region fallthrough
CT: control target
= control target key end

     0   :  { %v1626_v4 = vmov 0.0   ;;  %s1627_s18 = smov 18   ;;  %s1628_s23 = smov 19   ;;  %vm44_vm0 = vcmask 146432   ;;  %vm57_vm1 = vcmask 64512   ;;  %vm195_vm2 = vcmask 154624   ;;  %s1859_s2 = inlined_call_operand.vmem [shape: f32[8,768], index: 2, kind: input, shape index: {}]   ;;  %s1860_s0 = inlined_call_operand.vmem [shape: f32[9,8,8], index: 0, kind: input, shape index: {}]   ;;  %s1861_s1 = inlined_call_operand.vmem [shape: f32[8,1], index: 1, kind: input, shape index: {}]   ;;  %s1862_s3 = inlined_call_operand.vmem [shape: f32[8,768], index: 3, kind: output, shape index: {}]  }
   0x1   :  { %v1659_v0 = vld [vmem:[%s1859_s2 + $0x18] sm:$0xff]  ;;  %v1664_v1 = vld [vmem:[%s1859_s2 + $0x20] sm:$0xff]  ;;  %v1677_v6 = vld [vmem:[%s1859_s2 + $0x8] sm:$0xff]  ;;  %s1629_s26 = smov 17   ;;  %s1630_s27 = smov 1   ;;  %vm347_vm3 = vcmask 138240  }
   0x2   :  { %v1669_v2 = vld [vmem:[%s1859_s2] sm:$0xff]  ;;  %v1514_v3 = vpack.i.bf16 %v1664_v1, %v1659_v0  ;;  %v1682_v7 = vld [vmem:[%s1859_s2 + $0x10] sm:$0xff]  ;;  %v1689_v9 = vld [vmem:[%s1859_s2 + $0x28] sm:$0xff]  ;;  %s1631_s2 = smov 127   ;;  %s1632_s28 = smov 111   ;;  %vm505_vm4 = vcmask 7168  }
   0x3   :  { %v1504_v5 = vpack.i.bf16 %v1669_v2, %v1626_v4  ;;  %v1509_v8 = vpack.i.bf16 %v1682_v7, %v1677_v6  ;;  %v1564_v10 = vpack.i.bf16 %v1677_v6, %v1669_v2  ;;  %v1569_v11 = vpack.i.bf16 %v1659_v0, %v1682_v7  ;;  %s1633_s29 = smov 110   ;;  %s1634_s30 = smov 109   ;;  %v1432_v24 = vld [vmem:[%s1860_s0 + $0x8] sm:$0xff]  ;;  %v20_v50 = vld [vmem:[%s1860_s0] sm:$0xff]  ;;  %v1445_v63 = vld [vmem:[%s1860_s0 + $0x10] sm:$0xff] }
   0x4   :  { %1515 = vrot.lane.b32.xlu1 %v1514_v3, %s1627_s18  ;;  %v1574_v12 = vpack.i.bf16 %v1689_v9, %v1664_v1  ;;  %v1619_v13 = vpack.i.bf16 0.0, %v1689_v9  ;;  %vm794_vm5 = vcmask 1039360   ;;  %vm952_vm6 = vcmask 908288  }
   0x5   :  { %1505 = vrot.lane.b32.xlu0 %v1504_v5, %s1627_s18  ;;  %1520 = vrot.lane.b32.xlu2 %v1504_v5, %s1628_s23  ;;  %vm1110_vm7 = vcmask 900096   ;;  %vm1268_vm8 = vcmask 891904  }
   0xc   :  { %42 = vrot.lane.b32.xlu1 %v1689_v9, %s1627_s18 }
   0xd   :  { %1510 = vrot.lane.b32.xlu0 %v1509_v8, %s1627_s18  ;;  %1525 = vrot.lane.b32.xlu2 %v1509_v8, %s1628_s23 }
  0x14   :  { %193 = vrot.lane.b32.xlu1 %v1689_v9, %s1628_s23 }
  0x15   :  { %1530 = vrot.lane.b32.xlu0 %v1514_v3, %s1628_s23  ;;  %1535 = vrot.lane.b32.xlu2 %v1504_v5, %s1629_s26 }
  0x1c   :  { %1545 = vrot.lane.b32.xlu1 %v1514_v3, %s1629_s26 }
  0x1d   :  { %1540 = vrot.lane.b32.xlu0 %v1509_v8, %s1629_s26  ;;  %345 = vrot.lane.b32.xlu2 %v1689_v9, %s1629_s26 }
  0x24   :  { %1555 = vrot.lane.b32.xlu1 %v1509_v8, %s1630_s27 }
  0x25   :  { %1550 = vrot.lane.b32.xlu0 %v1504_v5, %s1630_s27  ;;  %1560 = vrot.lane.b32.xlu2 %v1514_v3, %s1630_s27 }
  0x2c   :  { %1565 = vrot.lane.b32.xlu1 %v1564_v10, %s1631_s2 }
  0x2d   :  { %503 = vrot.lane.b32.xlu0 %v1689_v9, %s1630_s27  ;;  %1570 = vrot.lane.b32.xlu2 %v1569_v11, %s1631_s2 }
  0x34   :  { %792 = vrot.lane.b32.xlu1 %v1626_v4, %s1631_s2 }
  0x35   :  { %1575 = vrot.lane.b32.xlu0 %v1574_v12, %s1631_s2  ;;  %1580 = vrot.lane.b32.xlu2 %v1564_v10, %s1632_s28 }
  0x3c   :  { %1590 = vrot.lane.b32.xlu1 %v1574_v12, %s1632_s28 }
  0x3d   :  { %1585 = vrot.lane.b32.xlu0 %v1569_v11, %s1632_s28  ;;  %950 = vrot.lane.b32.xlu2 %v1626_v4, %s1632_s28 }
  0x44   :  { %1600 = vrot.lane.b32.xlu1 %v1569_v11, %s1633_s29 }
  0x45   :  { %1595 = vrot.lane.b32.xlu0 %v1564_v10, %s1633_s29  ;;  %1605 = vrot.lane.b32.xlu2 %v1574_v12, %s1633_s29 }
  0x4c   :  { %1610 = vrot.lane.b32.xlu1 %v1564_v10, %s1634_s30 }
  0x4d   :  { %1108 = vrot.lane.b32.xlu0 %v1626_v4, %s1633_s29  ;;  %1615 = vrot.lane.b32.xlu2 %v1569_v11, %s1634_s30 }
  0x54   :  { %1620 = vrot.lane.b32.xlu1 %v1619_v13, %s1634_s30 }
  0x55   :  { %1262 = vrot.lane.b32.xlu0 %v1664_v1, %s1634_s30 }
  0x5f   :  { %v1521_v14 = vpop.permute.xlu2 %1520 }
  0x60   :  { %v1523_v31 = vunpack.i.h.bf16 %v1521_v14  ;;  %v1522_v32 = vunpack.i.l.bf16 %v1521_v14 }
  0x62   :  { %v196_v41 = vsel %vm195_vm2, %v1522_v32, %v1523_v31 }
  0x67   :  { %v1526_v15 = vpop.permute.xlu2 %1525 }
  0x68   :  { %v1528_v18 = vunpack.i.h.bf16 %v1526_v15  ;;  %v1527_v23 = vunpack.i.l.bf16 %v1526_v15 }
  0x6a   :  { %v198_v27 = vsel %vm195_vm2, %v1527_v23, %v1528_v18  ;;  %v197_v42 = vsel %vm195_vm2, %v1523_v31, %v1527_v23 }
  0x6f   :  { %v1536_v28 = vpop.permute.xlu2 %1535 }
  0x70   :  { %v1538_v35 = vunpack.i.h.bf16 %v1536_v28  ;;  %v1537_v36 = vunpack.i.l.bf16 %v1536_v28 }
  0x72   :  { %v348_v43 = vsel %vm347_vm3, %v1537_v36, %v1538_v35 }
  0x76   :  { %v1516_v16 = vpop.permute.xlu1 %1515 }
  0x77   :  { %v1506_v17 = vpop.permute.xlu0 %1505  ;;  %v1518_v19 = vunpack.i.h.bf16 %v1516_v16  ;;  %v1517_v20 = vunpack.i.l.bf16 %v1516_v16  ;;  %v346_v52 = vpop.permute.xlu2 %345 }
  0x78   :  { %v1508_v21 = vunpack.i.h.bf16 %v1506_v17  ;;  %v1507_v22 = vunpack.i.l.bf16 %v1506_v17 }
  0x79   :  { %v49_v26 = vsel %vm44_vm0, %v1517_v20, %v1518_v19 }
  0x7a   :  { %v45_v25 = vsel %vm44_vm0, %v1507_v22, %v1508_v21 }
  0x7b   :  { %76 = vmatpush.msra.mxu0 %v45_v25 }
  0x7c   :  { %1433 = vmatmul.msk.f32.vlgmr.msra.gmra.mxu0 %vm57_vm1, %v1432_v24 }
  0x7d   :  { %156 = vmatpush.msrb.mxu0 %v49_v26 }
  0x7e   :  { %v43_v29 = vpop.permute.xlu1 %42 }
  0x7f   :  { %266 = vmatpush.msra.mxu0 %v198_v27  ;;  %v1511_v30 = vpop.permute.xlu0 %1510  ;;  %v50_v40 = vsel %vm44_vm0, %v1518_v19, %v43_v29  ;;  %v1561_v4 = vpop.permute.xlu2 %1560 }
  0x80   :  { %v1513_v33 = vunpack.i.h.bf16 %v1511_v30  ;;  %v1512_v34 = vunpack.i.l.bf16 %v1511_v30  ;;  %v1563_v8 = vunpack.i.h.bf16 %v1561_v4  ;;  %v1562_v10 = vunpack.i.l.bf16 %v1561_v4  ;;  %v1459_v30 = vld [vmem:[%s1860_s0 + $0x20] sm:$0xff] }
  0x82   :  { %v46_v37 = vsel %vm44_vm0, %v1508_v21, %v1512_v34  ;;  %v47_v38 = vsel %vm44_vm0, %v1512_v34, %v1513_v33  ;;  %v48_v39 = vsel %vm44_vm0, %v1513_v33, %v1517_v20  ;;  %v510_v20 = vsel %vm505_vm4, %v1562_v10, %v1563_v8 }
  0x83   :  { %96 = vmatpush.msra.mxu1 %v46_v37  ;;  %116 = vmatpush.msra.mxu2 %v47_v38 }
  0x84   :  { %136 = vmatpush.msra.mxu3 %v48_v39  ;;  %1434 = vmatmul.msk.f32.vlgmr.msra.gmra.mxu1 %vm57_vm1, %v1432_v24 }
  0x85   :  { %1435 = vmatmul.msk.f32.vlgmr.msra.gmra.mxu2 %vm57_vm1, %v1432_v24  ;;  %1436 = vmatmul.msk.f32.vlgmr.msra.gmra.mxu3 %vm57_vm1, %v1432_v24 }
  0x86   :  { %1437 = vmatmul.msk.f32.vlgmr.msrb.gmra.mxu0 %vm57_vm1, %v1432_v24  ;;  %176 = vmatpush.msrb.mxu1 %v50_v40  ;;  %v194_v45 = vpop.permute.xlu1 %193 }
  0x87   :  { %226 = vmatpush.msrb.mxu2 %v196_v41  ;;  %246 = vmatpush.msrb.mxu3 %v197_v42  ;;  %v1531_v44 = vpop.permute.xlu0 %1530  ;;  %v1571_v25 = vpop.permute.xlu2 %1570 }
  0x88   :  { %v1533_v46 = vunpack.i.h.bf16 %v1531_v44  ;;  %v1532_v47 = vunpack.i.l.bf16 %v1531_v44  ;;  %378 = vmatpush.msrb.mxu0 %v348_v43  ;;  %v1572_v28 = vunpack.i.l.bf16 %v1571_v25  ;;  %v1573_v29 = vunpack.i.h.bf16 %v1571_v25 }
  0x8a   :  { %v201_v48 = vsel %vm195_vm2, %v1533_v46, %v194_v45  ;;  %v199_v49 = vsel %vm195_vm2, %v1528_v18, %v1532_v47  ;;  %v200_v51 = vsel %vm195_vm2, %v1532_v47, %v1533_v46  ;;  %v1466_v45 = vld [vmem:[%s1860_s0 + $0x28] sm:$0xff] }
  0x8b   :  { %286 = vmatpush.msra.mxu1 %v199_v49  ;;  %306 = vmatpush.msra.mxu2 %v200_v51 }
  0x8c   :  { %1438 = vmatmul.msk.f32.vlgmr.msrb.gmra.mxu1 %vm57_vm1, %v1432_v24  ;;  %326 = vmatpush.msra.mxu3 %v201_v48  ;;  %v1452_v24 = vld [vmem:[%s1860_s0 + $0x18] sm:$0xff] }
  0x8d   :  { %1439 = vmatmul.msk.f32.vlgmr.msrb.gmra.mxu2 %vm57_vm1, %v20_v50  ;;  %1440 = vmatmul.msk.f32.vlgmr.msrb.gmra.mxu3 %vm57_vm1, %v20_v50 }
  0x8e   :  { %1441 = vmatmul.msk.f32.vlgmr.msra.gmra.mxu0 %vm57_vm1, %v20_v50  ;;  %v1546_v53 = vpop.permute.xlu1 %1545 }
  0x8f   :  { %v1541_v54 = vpop.permute.xlu0 %1540  ;;  %v1548_v55 = vunpack.i.h.bf16 %v1546_v53  ;;  %v1547_v56 = vunpack.i.l.bf16 %v1546_v53 }
  0x90   :  { %v1543_v57 = vunpack.i.h.bf16 %v1541_v54  ;;  %v1542_v58 = vunpack.i.l.bf16 %v1541_v54 }
  0x91   :  { %v353_v62 = vsel %vm347_vm3, %v1548_v55, %v346_v52  ;;  %v352_v3 = vsel %vm347_vm3, %v1547_v56, %v1548_v55 }
  0x92   :  { %v349_v59 = vsel %vm347_vm3, %v1538_v35, %v1542_v58  ;;  %v350_v60 = vsel %vm347_vm3, %v1542_v58, %v1543_v57  ;;  %v351_v61 = vsel %vm347_vm3, %v1543_v57, %v1547_v56  ;;  %458 = vmatpush.msra.mxu0 %v352_v3  ;;  %v1473_v58 = vld [vmem:[%s1860_s0 + $0x30] sm:$0xff] }
  0x93   :  { %398 = vmatpush.msrb.mxu1 %v349_v59  ;;  %418 = vmatpush.msrb.mxu2 %v350_v60 }
  0x94   :  { %1442 = vmatmul.msk.f32.vlgmr.msra.gmra.mxu1 %vm57_vm1, %v20_v50  ;;  %438 = vmatpush.msrb.mxu3 %v351_v61 }
  0x95   :  { %1443 = vmatmul.msk.f32.vlgmr.msra.gmra.mxu2 %vm57_vm1, %v20_v50  ;;  %1444 = vmatmul.msk.f32.vlgmr.msra.gmra.mxu3 %vm57_vm1, %v20_v50 }
  0x96   :  { %1446 = vmatmul.msk.f32.vlgmr.msrb.gmra.mxu0 %vm57_vm1, %v1445_v63  ;;  %478 = vmatpush.msra.mxu1 %v353_v62  ;;  %v1556_v5 = vpop.permute.xlu1 %1555 }
  0x97   :  { %v1551_v11 = vpop.permute.xlu0 %1550  ;;  %v1558_v12 = vunpack.i.h.bf16 %v1556_v5  ;;  %v1557_v13 = vunpack.i.l.bf16 %v1556_v5 }
  0x98   :  { %v1553_v14 = vunpack.i.h.bf16 %v1551_v11  ;;  %v1552_v15 = vunpack.i.l.bf16 %v1551_v11 }
  0x99   :  { %v508_v18 = vsel %vm505_vm4, %v1557_v13, %v1558_v12  ;;  %v509_v19 = vsel %vm505_vm4, %v1558_v12, %v1562_v10 }
  0x9a   :  { %v506_v16 = vsel %vm505_vm4, %v1552_v15, %v1553_v14  ;;  %v507_v17 = vsel %vm505_vm4, %v1553_v14, %v1557_v13  ;;  %576 = vmatpush.msrb.mxu0 %v508_v18 }
  0x9b   :  { %536 = vmatpush.msra.mxu2 %v506_v16  ;;  %556 = vmatpush.msra.mxu3 %v507_v17 }
  0x9c   :  { %1447 = vmatmul.msk.f32.vlgmr.msrb.gmra.mxu1 %vm57_vm1, %v1445_v63 }
  0x9d   :  { %1448 = vmatmul.msk.f32.vlgmr.msrb.gmra.mxu2 %vm57_vm1, %v1445_v63  ;;  %1449 = vmatmul.msk.f32.vlgmr.msrb.gmra.mxu3 %vm57_vm1, %v1445_v63 }
  0x9e   :  { %1450 = vmatmul.msk.f32.vlgmr.msra.gmra.mxu0 %vm57_vm1, %v1445_v63  ;;  %596 = vmatpush.msrb.mxu1 %v509_v19  ;;  %v1566_v22 = vpop.permute.xlu1 %1565 }
  0x9f   :  { %v504_v21 = vpop.permute.xlu0 %503  ;;  %616 = vmatpush.msrb.mxu2 %v510_v20  ;;  %667 = vmatpush.msra.mxu0 %v1669_v2  ;;  %v1568_v26 = vunpack.i.h.bf16 %v1566_v22  ;;  %v1567_v27 = vunpack.i.l.bf16 %v1566_v22 }
  0xa0   :  { %v511_v23 = vsel %vm505_vm4, %v1563_v8, %v504_v21  ;;  %v1480_v21 = vld [vmem:[%s1860_s0 + $0x38] sm:$0xff] }
  0xa1   :  { %636 = vmatpush.msrb.mxu3 %v511_v23 }
  0xa4   :  { %1451 = vmatmul.msk.f32.vlgmr.msra.gmra.mxu1 %vm57_vm1, %v1445_v63 }
  0xa5   :  { %1453 = vmatmul.msk.f32.vlgmr.msra.gmra.mxu2 %vm57_vm1, %v1452_v24  ;;  %1454 = vmatmul.msk.f32.vlgmr.msra.gmra.mxu3 %vm57_vm1, %v1452_v24 }
  0xa6   :  { %1455 = vmatmul.msk.f32.vlgmr.msrb.gmra.mxu0 %vm57_vm1, %v1452_v24  ;;  %687 = vmatpush.msra.mxu1 %v1677_v6  ;;  %v793_v2 = vpop.permute.xlu1 %792  ;;  %v795_v6 = vsel %vm794_vm5, %v1567_v27, %v1568_v26  ;;  %v1635_v27 = vmov 0  }
  0xa7   :  { %707 = vmatpush.msra.mxu2 %v1682_v7  ;;  %727 = vmatpush.msra.mxu3 %v1659_v0  ;;  %v1576_v31 = vpop.permute.xlu0 %1575  ;;  %v796_v7 = vsel %vm794_vm5, %v1568_v26, %v1572_v28  ;;  %v797_v0 = vsel %vm794_vm5, %v1572_v28, %v1573_v29  ;;  %v1410_v26 = vld [vmem:[%s1861_s1] sm:$0xff] }
  0xa8   :  { %747 = vmatpush.msrb.mxu0 %v1664_v1  ;;  %v1581_v1 = vpop.permute.xlu2 %1580  ;;  %v1577_v32 = vunpack.i.l.bf16 %v1576_v31  ;;  %v1578_v33 = vunpack.i.h.bf16 %v1576_v31  ;;  %1624 = vset.pattern.permute.xlu2 %v1635_v27  ;;  %v1487_v28 = vld [vmem:[%s1860_s0 + $0x40] sm:$0xff] }
  0xa9   :  { %v1583_v35 = vunpack.i.h.bf16 %v1581_v1  ;;  %v1582_v36 = vunpack.i.l.bf16 %v1581_v1  ;;  %1625 = vset.pattern.permute.xlu0 %v1635_v27  ;;  %1413 = vperm.xlu2 %1624, %v1410_v26  }
  0xaa   :  { %v798_v37 = vsel %vm794_vm5, %v1573_v29, %v1577_v32  ;;  %v800_v39 = vsel %vm794_vm5, %v1578_v33, %v793_v2  ;;  %v799_v40 = vsel %vm794_vm5, %v1577_v32, %v1578_v33 }
  0xac   :  { %1456 = vmatmul.msk.f32.vlgmr.msrb.gmra.mxu1 %vm57_vm1, %v1452_v24 }
  0xad   :  { %1457 = vmatmul.msk.f32.vlgmr.msrb.gmra.mxu2 %vm57_vm1, %v1452_v24  ;;  %1458 = vmatmul.msk.f32.vlgmr.msrb.gmra.mxu3 %vm57_vm1, %v1452_v24 }
  0xae   :  { %1460 = vmatmul.msk.f32.vlgmr.msra.gmra.mxu0 %vm57_vm1, %v1459_v30  ;;  %767 = vmatpush.msrb.mxu1 %v1689_v9  ;;  %v1591_v34 = vpop.permute.xlu1 %1590  ;;  %v953_v9 = vsel %vm952_vm6, %v1582_v36, %v1583_v35 }
  0xaf   :  { %825 = vmatpush.msrb.mxu2 %v795_v6  ;;  %845 = vmatpush.msrb.mxu3 %v796_v7  ;;  %v1586_v38 = vpop.permute.xlu0 %1585  ;;  %v1592_v42 = vunpack.i.l.bf16 %v1591_v34  ;;  %v1593_v44 = vunpack.i.h.bf16 %v1591_v34 }
  0xb0   :  { %865 = vmatpush.msra.mxu0 %v797_v0  ;;  %v1587_v41 = vunpack.i.l.bf16 %v1586_v38  ;;  %v1588_v43 = vunpack.i.h.bf16 %v1586_v38  ;;  %v951_v46 = vpop.permute.xlu2 %950 }
  0xb1   :  { %v957_v51 = vsel %vm952_vm6, %v1592_v42, %v1593_v44  ;;  %v958_v57 = vsel %vm952_vm6, %v1593_v44, %v951_v46 }
  0xb2   :  { %v954_v48 = vsel %vm952_vm6, %v1583_v35, %v1587_v41  ;;  %v955_v49 = vsel %vm952_vm6, %v1587_v41, %v1588_v43  ;;  %v956_v50 = vsel %vm952_vm6, %v1588_v43, %v1592_v42 }
  0xb4   :  { %1461 = vmatmul.msk.f32.vlgmr.msra.gmra.mxu1 %vm57_vm1, %v1459_v30 }
  0xb5   :  { %1462 = vmatmul.msk.f32.vlgmr.msra.gmra.mxu2 %vm57_vm1, %v1459_v30  ;;  %1463 = vmatmul.msk.f32.vlgmr.msra.gmra.mxu3 %vm57_vm1, %v1459_v30 }
  0xb6   :  { %1464 = vmatmul.msk.f32.vlgmr.msrb.gmra.mxu0 %vm57_vm1, %v1459_v30  ;;  %885 = vmatpush.msra.mxu1 %v798_v37  ;;  %v1601_v47 = vpop.permute.xlu1 %1600 }
  0xb7   :  { %905 = vmatpush.msra.mxu2 %v799_v40  ;;  %925 = vmatpush.msra.mxu3 %v800_v39  ;;  %v1596_v52 = vpop.permute.xlu0 %1595  ;;  %v1602_v53 = vunpack.i.l.bf16 %v1601_v47  ;;  %v1603_v56 = vunpack.i.h.bf16 %v1601_v47 }
  0xb8   :  { %983 = vmatpush.msrb.mxu0 %v953_v9  ;;  %v1598_v54 = vunpack.i.h.bf16 %v1596_v52  ;;  %v1597_v55 = vunpack.i.l.bf16 %v1596_v52  ;;  %v1606_v59 = vpop.permute.xlu2 %1605 }
  0xb9   :  { %v1113_v63 = vsel %vm1110_vm7, %v1602_v53, %v1603_v56  ;;  %v1607_v3 = vunpack.i.l.bf16 %v1606_v59  ;;  %v1608_v5 = vunpack.i.h.bf16 %v1606_v59 }
  0xba   :  { %v1111_v60 = vsel %vm1110_vm7, %v1597_v55, %v1598_v54  ;;  %v1112_v61 = vsel %vm1110_vm7, %v1598_v54, %v1602_v53 }
  0xbb   :  { %v1114_v11 = vsel %vm1110_vm7, %v1603_v56, %v1607_v3  ;;  %v1115_v13 = vsel %vm1110_vm7, %v1607_v3, %v1608_v5 }
  0xbc   :  { %1465 = vmatmul.msk.f32.vlgmr.msrb.gmra.mxu1 %vm57_vm1, %v1459_v30 }
  0xbd   :  { %1467 = vmatmul.msk.f32.vlgmr.msrb.gmra.mxu2 %vm57_vm1, %v1466_v45  ;;  %1468 = vmatmul.msk.f32.vlgmr.msrb.gmra.mxu3 %vm57_vm1, %v1466_v45 }
  0xbe   :  { %1469 = vmatmul.msk.f32.vlgmr.msra.gmra.mxu0 %vm57_vm1, %v1466_v45  ;;  %1003 = vmatpush.msrb.mxu1 %v954_v48  ;;  %v1611_v62 = vpop.permute.xlu1 %1610 }
  0xbf   :  { %1023 = vmatpush.msrb.mxu2 %v955_v49  ;;  %1043 = vmatpush.msrb.mxu3 %v956_v50  ;;  %v1109_v4 = vpop.permute.xlu0 %1108  ;;  %v1613_v8 = vunpack.i.h.bf16 %v1611_v62  ;;  %v1612_v10 = vunpack.i.l.bf16 %v1611_v62 }
  0xc0   :  { %1063 = vmatpush.msra.mxu0 %v957_v51  ;;  %v1116_v12 = vsel %vm1110_vm7, %v1608_v5, %v1109_v4  ;;  %v1616_v14 = vpop.permute.xlu2 %1615 }
  0xc1   :  { %v1269_v15 = vsel %vm1268_vm8, %v1612_v10, %v1613_v8  ;;  %v1617_v17 = vunpack.i.l.bf16 %v1616_v14  ;;  %v1618_v18 = vunpack.i.h.bf16 %v1616_v14 }
  0xc3   :  { %v1270_v22 = vsel %vm1268_vm8, %v1613_v8, %v1617_v17  ;;  %v1271_v24 = vsel %vm1268_vm8, %v1617_v17, %v1618_v18 }
  0xc4   :  { %1470 = vmatmul.msk.f32.vlgmr.msra.gmra.mxu1 %vm57_vm1, %v1466_v45 }
  0xc5   :  { %1471 = vmatmul.msk.f32.vlgmr.msra.gmra.mxu2 %vm57_vm1, %v1466_v45  ;;  %1472 = vmatmul.msk.f32.vlgmr.msra.gmra.mxu3 %vm57_vm1, %v1466_v45 }
  0xc6   :  { %1474 = vmatmul.msk.f32.vlgmr.msrb.gmra.mxu0 %vm57_vm1, %v1473_v58  ;;  %1083 = vmatpush.msra.mxu1 %v958_v57  ;;  %v1621_v16 = vpop.permute.xlu1 %1620 }
  0xc7   :  { %1141 = vmatpush.msra.mxu2 %v1111_v60  ;;  %1161 = vmatpush.msra.mxu3 %v1112_v61  ;;  %v1622_v19 = vunpack.i.l.bf16 %v1621_v16  ;;  %v1263_v20 = vpop.permute.xlu0 %1262  ;;  %v1623_v2 = vunpack.i.h.bf16 %v1621_v16 }
  0xc8   :  { %1181 = vmatpush.msrb.mxu0 %v1113_v63  ;;  %v1272_v23 = vsel %vm1268_vm8, %v1618_v18, %v1263_v20 }
  0xc9   :  { %v1273_v25 = vsel %vm1268_vm8, %v1263_v20, %v1622_v19  ;;  %v1274_v29 = vsel %vm1268_vm8, %v1622_v19, %v1623_v2 }
  0xcc   :  { %1475 = vmatmul.msk.f32.vlgmr.msrb.gmra.mxu1 %vm57_vm1, %v1473_v58 }
  0xcd   :  { %1476 = vmatmul.msk.f32.vlgmr.msrb.gmra.mxu2 %vm57_vm1, %v1473_v58  ;;  %1477 = vmatmul.msk.f32.vlgmr.msrb.gmra.mxu3 %vm57_vm1, %v1473_v58 }
  0xce   :  { %1478 = vmatmul.msk.f32.vlgmr.msra.gmra.mxu0 %vm57_vm1, %v1473_v58  ;;  %1201 = vmatpush.msrb.mxu1 %v1114_v11 }
  0xcf   :  { %1221 = vmatpush.msrb.mxu2 %v1115_v13  ;;  %1241 = vmatpush.msrb.mxu3 %v1116_v12 }
  0xd0   :  { %1299 = vmatpush.msra.mxu0 %v1269_v15 }
  0xd4   :  { %1479 = vmatmul.msk.f32.vlgmr.msra.gmra.mxu1 %vm57_vm1, %v1473_v58 }
  0xd5   :  { %1481 = vmatmul.msk.f32.vlgmr.msra.gmra.mxu2 %vm57_vm1, %v1480_v21  ;;  %1482 = vmatmul.msk.f32.vlgmr.msra.gmra.mxu3 %vm57_vm1, %v1480_v21 }
  0xd6   :  { %1483 = vmatmul.msk.f32.vlgmr.msrb.gmra.mxu0 %vm57_vm1, %v1480_v21  ;;  %1319 = vmatpush.msra.mxu1 %v1270_v22 }
  0xd7   :  { %1339 = vmatpush.msra.mxu2 %v1271_v24  ;;  %1359 = vmatpush.msra.mxu3 %v1272_v23 }
  0xd8   :  { %1379 = vmatpush.msrb.mxu0 %v1273_v25 }
  0xdc   :  { %1484 = vmatmul.msk.f32.vlgmr.msrb.gmra.mxu1 %vm57_vm1, %v1480_v21 }
  0xdd   :  { %1485 = vmatmul.msk.f32.vlgmr.msrb.gmra.mxu2 %vm57_vm1, %v1480_v21  ;;  %1486 = vmatmul.msk.f32.vlgmr.msrb.gmra.mxu3 %vm57_vm1, %v1480_v21 }
  0xde   :  { %1488 = vmatmul.msk.f32.vlgmr.msra.gmra.mxu0 %vm57_vm1, %v1487_v28  ;;  %1399 = vmatpush.msrb.mxu1 %v1274_v29 }
  0xe4   :  { %1489 = vmatmul.msk.f32.vlgmr.msra.gmra.mxu1 %vm57_vm1, %v1487_v28 }
  0xe5   :  { %1490 = vmatmul.msk.f32.vlgmr.msra.gmra.mxu2 %vm57_vm1, %v1487_v28  ;;  %1491 = vmatmul.msk.f32.vlgmr.msra.gmra.mxu3 %vm57_vm1, %v1487_v28 }
  0xe6   :  { %1492 = vmatmul.msk.f32.vlgmr.msrb.gmra.mxu0 %vm57_vm1, %v1487_v28 }
  0xec   :  { %1493 = vmatmul.msk.f32.vlgmr.msrb.gmra.mxu1 %vm57_vm1, %v1487_v28 }
  0xf9   :  { %v78_v30 = vpop.f32.mrf.mxu0 }
 0x101   :  { %v98_v31 = vpop.f32.mrf.mxu1 }
 0x103   :  { %v158_v6 = vpop.f32.mrf.mxu0 }
 0x108   :  { %v118_v7 = vpop.f32.mrf.mxu2  ;;  %v138_v0 = vpop.f32.mrf.mxu3 }
 0x109   :  { %v178_v1 = vpop.f32.mrf.mxu1 }
 0x10b   :  { %v268_v32 = vpop.f32.mrf.mxu0 }
 0x10c   :  { %v269_v33 = vadd.f32 %v268_v32, %v118_v7 }
 0x110   :  { %v228_v34 = vpop.f32.mrf.mxu2  ;;  %v248_v35 = vpop.f32.mrf.mxu3 }
 0x111   :  { %v249_v36 = vadd.f32 %v248_v35, %v98_v31  ;;  %v288_v37 = vpop.f32.mrf.mxu1  ;;  %v229_v3 = vadd.f32 %v228_v34, %v78_v30 }
 0x112   :  { %v289_v38 = vadd.f32 %v288_v37, %v138_v0  ;;  %v1414_v0 = vpop.permute.xlu2 %1413 }
 0x113   :  { %v380_v39 = vpop.f32.mrf.mxu0 }
 0x114   :  { %v483_v10 = vadd.f32 %v380_v39, %v229_v3 }
 0x118   :  { %v308_v40 = vpop.f32.mrf.mxu2  ;;  %v328_v9 = vpop.f32.mrf.mxu3 }
 0x119   :  { %v329_v41 = vadd.f32 %v328_v9, %v178_v1  ;;  %v400_v42 = vpop.f32.mrf.mxu1  ;;  %v309_v13 = vadd.f32 %v308_v40, %v158_v6 }
 0x11a   :  { %v484_v22 = vadd.f32 %v400_v42, %v249_v36 }
 0x11b   :  { %v460_v43 = vpop.f32.mrf.mxu0 }
 0x11c   :  { %v487_v18 = vadd.f32 %v460_v43, %v309_v13 }
 0x120   :  { %v420_v44 = vpop.f32.mrf.mxu2  ;;  %v440_v45 = vpop.f32.mrf.mxu3 }
 0x121   :  { %v480_v46 = vpop.f32.mrf.mxu1  ;;  %v485_v23 = vadd.f32 %v420_v44, %v269_v33  ;;  %v486_v34 = vadd.f32 %v440_v45, %v289_v38 }
 0x122   :  { %v488_v37 = vadd.f32 %v480_v46, %v329_v41 }
 0x123   :  { %v578_v47 = vpop.f32.mrf.mxu0 }
 0x124   :  { %v643_v31 = vadd.f32 %v578_v47, %v485_v23 }
 0x128   :  { %v538_v48 = vpop.f32.mrf.mxu2  ;;  %v558_v49 = vpop.f32.mrf.mxu3 }
 0x129   :  { %v598_v50 = vpop.f32.mrf.mxu1  ;;  %v641_v12 = vadd.f32 %v538_v48, %v483_v10  ;;  %v642_v25 = vadd.f32 %v558_v49, %v484_v22 }
 0x12a   :  { %v644_v33 = vadd.f32 %v598_v50, %v486_v34 }
 0x12b   :  { %v669_v51 = vpop.f32.mrf.mxu0 }
 0x12c   :  { %v772_v16 = vadd.f32 %v669_v51, %v641_v12 }
 0x130   :  { %v618_v52 = vpop.f32.mrf.mxu2  ;;  %v638_v53 = vpop.f32.mrf.mxu3 }
 0x131   :  { %v689_v54 = vpop.f32.mrf.mxu1  ;;  %v645_v21 = vadd.f32 %v618_v52, %v487_v18  ;;  %v646_v9 = vadd.f32 %v638_v53, %v488_v37 }
 0x132   :  { %v773_v30 = vadd.f32 %v689_v54, %v642_v25 }
 0x133   :  { %v749_v55 = vpop.f32.mrf.mxu0 }
 0x134   :  { %v776_v27 = vadd.f32 %v749_v55, %v645_v21 }
 0x138   :  { %v709_v56 = vpop.f32.mrf.mxu2  ;;  %v729_v57 = vpop.f32.mrf.mxu3 }
 0x139   :  { %v769_v58 = vpop.f32.mrf.mxu1  ;;  %v774_v35 = vadd.f32 %v709_v56, %v643_v31  ;;  %v775_v47 = vadd.f32 %v729_v57, %v644_v33 }
 0x13a   :  { %v777_v52 = vadd.f32 %v769_v58, %v646_v9 }
 0x13b   :  { %v867_v59 = vpop.f32.mrf.mxu0 }
 0x13c   :  { %v932_v48 = vadd.f32 %v867_v59, %v774_v35 }
 0x140   :  { %v827_v60 = vpop.f32.mrf.mxu2  ;;  %v847_v61 = vpop.f32.mrf.mxu3 }
 0x141   :  { %v887_v62 = vpop.f32.mrf.mxu1  ;;  %v930_v19 = vadd.f32 %v827_v60, %v772_v16  ;;  %v931_v1 = vadd.f32 %v847_v61, %v773_v30 }
 0x142   :  { %v933_v45 = vadd.f32 %v887_v62, %v775_v47 }
 0x143   :  { %v985_v63 = vpop.f32.mrf.mxu0 }
 0x144   :  { %v1088_v24 = vadd.f32 %v985_v63, %v930_v19 }
 0x148   :  { %v907_v4 = vpop.f32.mrf.mxu2  ;;  %v927_v5 = vpop.f32.mrf.mxu3 }
 0x149   :  { %v1005_v8 = vpop.f32.mrf.mxu1  ;;  %v934_v6 = vadd.f32 %v907_v4, %v776_v27  ;;  %v935_v54 = vadd.f32 %v927_v5, %v777_v52 }
 0x14a   :  { %v1089_v39 = vadd.f32 %v1005_v8, %v931_v1 }
 0x14b   :  { %v1065_v11 = vpop.f32.mrf.mxu0 }
 0x14c   :  { %v1092_v40 = vadd.f32 %v1065_v11, %v934_v6 }
 0x150   :  { %v1025_v14 = vpop.f32.mrf.mxu2  ;;  %v1045_v15 = vpop.f32.mrf.mxu3 }
 0x151   :  { %v1085_v17 = vpop.f32.mrf.mxu1  ;;  %v1090_v41 = vadd.f32 %v1025_v14, %v932_v48  ;;  %v1091_v53 = vadd.f32 %v1045_v15, %v933_v45 }
 0x152   :  { %v1093_v56 = vadd.f32 %v1085_v17, %v935_v54 }
 0x153   :  { %v1183_v20 = vpop.f32.mrf.mxu0 }
 0x154   :  { %v1248_v61 = vadd.f32 %v1183_v20, %v1090_v41 }
 0x158   :  { %v1143_v2 = vpop.f32.mrf.mxu2  ;;  %v1163_v26 = vpop.f32.mrf.mxu3 }
 0x159   :  { %v1246_v28 = vadd.f32 %v1143_v2, %v1088_v24  ;;  %v1203_v29 = vpop.f32.mrf.mxu1  ;;  %v1247_v42 = vadd.f32 %v1163_v26, %v1089_v39 }
 0x15a   :  { %v1249_v57 = vadd.f32 %v1203_v29, %v1091_v53 }
 0x15b   :  { %v1301_v7 = vpop.f32.mrf.mxu0 }
 0x15c   :  { %v1404_v32 = vadd.f32 %v1301_v7, %v1246_v28 }
 0x15e   :  { %v1416_v36 = vadd.f32 %v1414_v0, %v1404_v32 }
 0x160   :  { %1422 = vst [vmem:[%s1862_s3] sm:$0xff] %v1416_v36  ;;  %v1223_v43 = vpop.f32.mrf.mxu2  ;;  %v1243_v44 = vpop.f32.mrf.mxu3 }
 0x161   :  { %v1250_v49 = vadd.f32 %v1223_v43, %v1092_v40  ;;  %v1321_v51 = vpop.f32.mrf.mxu1  ;;  %v1251_v59 = vadd.f32 %v1243_v44, %v1093_v56 }
 0x162   :  { %v1405_v38 = vadd.f32 %v1321_v51, %v1247_v42 }
 0x163   :  { %v1381_v46 = vpop.f32.mrf.mxu0 }
 0x164   :  { %v1417_v50 = vadd.f32 %v1414_v0, %v1405_v38  ;;  %v1408_v55 = vadd.f32 %v1381_v46, %v1250_v49 }
 0x166   :  { %1423 = vst [vmem:[%s1862_s3 + $0x8] sm:$0xff] %v1417_v50  ;;  %v1420_v60 = vadd.f32 %v1414_v0, %v1408_v55 }
 0x168   :  { %1426 = vst [vmem:[%s1862_s3 + $0x20] sm:$0xff] %v1420_v60  ;;  %v1341_v58 = vpop.f32.mrf.mxu2  ;;  %v1361_v62 = vpop.f32.mrf.mxu3 }
 0x169   :  { %v1406_v63 = vadd.f32 %v1341_v58, %v1248_v61  ;;  %v1407_v3 = vadd.f32 %v1361_v62, %v1249_v57  ;;  %v1401_v4 = vpop.f32.mrf.mxu1 }
 0x16a   :  { %v1409_v5 = vadd.f32 %v1401_v4, %v1251_v59 }
 0x16b   :  { %v1418_v8 = vadd.f32 %v1414_v0, %v1406_v63  ;;  %v1419_v10 = vadd.f32 %v1414_v0, %v1407_v3 }
 0x16c   :  { %v1421_v11 = vadd.f32 %v1414_v0, %v1409_v5 }
 0x16d   :  { %1424 = vst [vmem:[%s1862_s3 + $0x10] sm:$0xff] %v1418_v8 }
 0x16e   :  { %1425 = vst [vmem:[%s1862_s3 + $0x18] sm:$0xff] %v1419_v10 }
 0x16f   :  { %1427 = vst [vmem:[%s1862_s3 + $0x28] sm:$0xff] %v1421_v11 }

</bundles_post_ra>
